<compile_context>
chip_gen: v5e
topology: v5e:2x2
jax: 0.10.0
libtpu: 0.0.40
codegen_flags: <defaults>
</compile_context>

<pallas_src>
import functools

import jax
import jax.numpy as jnp
from jax import lax
from jax.experimental import pallas as pl
from jax.experimental.pallas import tpu as pltpu


def _round_up(n: int, m: int) -> int:
    return ((n + m - 1) // m) * m


def _autoencoder_kernel(x_ref, w1_ref, b1_ref, w2_ref, b2_ref, o_ref):
    # x_ref : (TILE_B, F)  native dtype (streamed per grid step)
    # w1_ref: (H, F)       bf16, VMEM-resident (PyTorch layout, contract F)
    # b1_ref: (1, H)       f32,  resident
    # w2_ref: (O, H)       bf16, resident (PyTorch layout, contract H)
    # b2_ref: (1, O)       f32,  resident
    # o_ref : (TILE_B, O)

    # In-kernel cast of the streamed activation tile (hidden under DMA) —
    # bf16 inputs run the MXU at full rate on v5e/v6e/v7x; accumulation is f32.
    x = x_ref[...].astype(jnp.bfloat16)

    # Encoder: contract x's feature axis with w1's in-feature axis (== x @ w1.T).
    h = lax.dot_general(
        x, w1_ref[...],
        dimension_numbers=(((1,), (1,)), ((), ())),
        preferred_element_type=jnp.float32)              # (TILE_B, H) f32

    # Bias + ReLU epilogue in f32 (v5e's VPU has no bf16 path).
    h = jnp.maximum(h + b1_ref[...], 0.0)

    # Decoder: bf16 activations back into the MXU, f32 accumulation.
    y = lax.dot_general(
        h.astype(jnp.bfloat16), w2_ref[...],
        dimension_numbers=(((1,), (1,)), ((), ())),
        preferred_element_type=jnp.float32)              # (TILE_B, O) f32

    o_ref[...] = (y + b2_ref[...]).astype(o_ref.dtype)


@functools.partial(jax.jit, static_argnames=("tile_b", "core_parallel"))
def _linear_autoencoder_impl(x, w_enc, b_enc, w_dec, b_dec, *, tile_b,
                             core_parallel):
    B, F = x.shape
    H = w_enc.shape[0]
    O = w_dec.shape[0]
    out_dtype = x.dtype
    x_isz = jnp.dtype(x.dtype).itemsize
    o_isz = jnp.dtype(out_dtype).itemsize

    # Resident weights are tiny: one-time bf16 cast in the wrapper halves their
    # HBM->VMEM DMA.  Biases stay f32 for the epilogue.
    w1 = w_enc.astype(jnp.bfloat16)                      # (H, F), no transpose copy
    w2 = w_dec.astype(jnp.bfloat16)                      # (O, H)
    b1 = b_enc.astype(jnp.float32).reshape(1, H)
    b2 = b_dec.astype(jnp.float32).reshape(1, O)

    # --- batch tiling ------------------------------------------------------
    # Clamp the tile for small B (bounded padding waste), keep it a multiple of
    # 16 (bf16 sublane packing of the in-kernel cast; also satisfies the
    # (8, 128) sublane constraint).
    tb = max(16, _round_up(min(tile_b, _round_up(B, 16)), 16))
    n_tiles = pl.cdiv(B, tb)
    # On v7x give each TensorCore at least one tile (balanced split).
    if core_parallel and n_tiles == 1 and tb >= 32:
        tb = _round_up(pl.cdiv(B, 2), 16)
        n_tiles = pl.cdiv(B, tb)
    b_pad = n_tiles * tb
    if b_pad != B:
        # Padded rows produce garbage (bias->ReLU->decoder); sliced off below.
        x = jnp.pad(x, ((0, b_pad - B), (0, 0)))

    # --- advisory cost / VMEM budget ---------------------------------------
    flops = 2 * b_pad * (F * H + H * O)
    bytes_accessed = (b_pad * F * x_isz + w1.size * 2 + w2.size * 2
                      + b1.size * 4 + b2.size * 4 + b_pad * O * o_isz)
    # Double-buffered streamed tiles + (worst case double-buffered) residents;
    # 2x headroom, capped under v7x's 64 MiB physical VMEM (v5e/v6e have 128).
    est_vmem = (2 * tb * F * x_isz + 2 * tb * O * o_isz
                + 2 * (w1.size * 2 + w2.size * 2 + b1.size * 4 + b2.size * 4))
    vmem_limit = int(min(max(16 * 2**20, 2 * est_vmem), 64 * 2**20))

    dim_sem = (pltpu.CORE_PARALLEL,) if core_parallel else ("parallel",)

    out = pl.pallas_call(
        _autoencoder_kernel,
        out_shape=jax.ShapeDtypeStruct((b_pad, O), out_dtype),
        grid=(n_tiles,),
        in_specs=[
            # streamed batch tile (software-pipelined across grid steps)
            pl.BlockSpec((tb, F), lambda i: (i, 0)),
            # weights / biases: constant block index -> DMA'd once, VMEM-resident
            pl.BlockSpec((H, F), lambda i: (0, 0)),
            pl.BlockSpec((1, H), lambda i: (0, 0)),
            pl.BlockSpec((O, H), lambda i: (0, 0)),
            pl.BlockSpec((1, O), lambda i: (0, 0)),
        ],
        # Unpadded output width: masked vst is VMEM-side only; avoids 8x padded
        # f32 writeback + a second wrapper HBM pass.
        out_specs=pl.BlockSpec((tb, O), lambda i: (i, 0)),
        compiler_params=pltpu.CompilerParams(
            dimension_semantics=dim_sem,
            vmem_limit_bytes=vmem_limit,
        ),
        cost_estimate=pl.CostEstimate(
            flops=flops, transcendentals=0, bytes_accessed=bytes_accessed),
    )(x, w1, b1, w2, b2)

    # Strip batch padding only when it exists (no extra pass otherwise).
    return out[:B] if b_pad != B else out


def linear_autoencoder(x, w_enc, b_enc, w_dec, b_dec, *, tile_b=512,
                       core_parallel=None):
    """Forward pass of LinearAutoEncoder.

    x: (B, F).  w_enc: (H, F), b_enc: (H,), w_dec: (O, H), b_dec: (O,)
    (PyTorch nn.Linear layout).  Matmuls run in bf16 with f32 accumulation.
    """
    if core_parallel is None:
        # v7x (two TensorCores per chip) benefits from CORE_PARALLEL; plain
        # "parallel" is the portable choice on single-TC v5e/v6e.
        kind = jax.devices()[0].device_kind.lower()
        core_parallel = "7" in kind
    if core_parallel:
        try:
            return _linear_autoencoder_impl(x, w_enc, b_enc, w_dec, b_dec,
                                            tile_b=tile_b, core_parallel=True)
        except Exception:
            # Safety net: fall back to portable semantics if this Mosaic build
            # rejects CORE_PARALLEL for this grid.
            pass
    return _linear_autoencoder_impl(x, w_enc, b_enc, w_dec, b_dec,
                                    tile_b=tile_b, core_parallel=False)


def _torch_linear_init(key, out_features, in_features):
    """Deterministic init mimicking nn.Linear: U(-1/sqrt(in), 1/sqrt(in))."""
    kw, kb = jax.random.split(key)
    bound = 1.0 / jnp.sqrt(in_features)
    w = jax.random.uniform(kw, (out_features, in_features),
                           minval=-bound, maxval=bound, dtype=jnp.float32)
    b = jax.random.uniform(kb, (out_features,),
                           minval=-bound, maxval=bound, dtype=jnp.float32)
    return w, b


if __name__ == "__main__":
    features, hidden, out_features = 32, 64, 16
    batch = 1000     # not a multiple of the tile -> exercises batch padding
    tile_b = 512     # -> 2 pipelined grid steps (and a balanced v7x split)

    key = jax.random.PRNGKey(0)
    k_x, k_enc, k_dec = jax.random.split(key, 3)

    x = jax.random.normal(k_x, (batch, features), dtype=jnp.float32)
    w_enc, b_enc = _torch_linear_init(k_enc, hidden, features)
    w_dec, b_dec = _torch_linear_init(k_dec, out_features, hidden)

    out = linear_autoencoder(x, w_enc, b_enc, w_dec, b_dec, tile_b=tile_b)
    out = jax.block_until_ready(out)

    # Reference in plain f32 JAX (kernel uses bf16 matmul inputs, f32 accum).
    ref = jnp.maximum(x @ w_enc.T + b_enc, 0.0) @ w_dec.T + b_dec
    assert out.shape == (batch, out_features)
    assert jnp.allclose(out, ref, atol=3e-2, rtol=3e-2), (
        float(jnp.max(jnp.abs(out - ref))))

    print("KERNEL_OK")
</pallas_src>

<mosaic_0001>
module attributes {stable_mosaic.version = 11 : i64} {
  func.func @_autoencoder_kernel(%arg0: i32, %arg1: memref<512x32xf32, #tpu.memory_space<vmem>>, %arg2: memref<64x32xbf16, #tpu.memory_space<vmem>>, %arg3: memref<1x64xf32, #tpu.memory_space<vmem>>, %arg4: memref<16x64xbf16, #tpu.memory_space<vmem>>, %arg5: memref<1x16xf32, #tpu.memory_space<vmem>>, %arg6: memref<512x16xf32, #tpu.memory_space<vmem>>) attributes {dimension_semantics = [#tpu.dimension_semantics<parallel>], iteration_bounds = array<i64: 2>, scalar_prefetch = 0 : i64, scratch_operands = 0 : i64, tpu.core_type = #tpu.core_type<tc>, window_params = [{transform_indices = @transform_0, window_bounds = array<i64: 512, 32>}, {pipeline_mode = #tpu.pipeline_mode<synchronous>, transform_indices = @transform_1, window_bounds = array<i64: 64, 32>}, {pipeline_mode = #tpu.pipeline_mode<synchronous>, transform_indices = @transform_2, window_bounds = array<i64: 1, 64>}, {pipeline_mode = #tpu.pipeline_mode<synchronous>, transform_indices = @transform_3, window_bounds = array<i64: 16, 64>}, {pipeline_mode = #tpu.pipeline_mode<synchronous>, transform_indices = @transform_4, window_bounds = array<i64: 1, 16>}, {transform_indices = @transform_5, window_bounds = array<i64: 512, 16>}]} {
    %c0 = arith.constant 0 : index
    %c0_0 = arith.constant 0 : index
    %0 = vector.load %arg1[%c0, %c0_0] : memref<512x32xf32, #tpu.memory_space<vmem>>, vector<512x32xf32>
    %1 = arith.truncf %0 : vector<512x32xf32> to vector<512x32xbf16>
    %c0_1 = arith.constant 0 : index
    %c0_2 = arith.constant 0 : index
    %2 = vector.load %arg2[%c0_1, %c0_2] : memref<64x32xbf16, #tpu.memory_space<vmem>>, vector<64x32xbf16>
    %cst = arith.constant dense<0.000000e+00> : vector<512x64xf32>
    %3 = tpu.matmul %1, %2, %cst {dimension_numbers = #tpu.dot_dimension_numbers<[1], [1], [0], [0], [0, 0, 1, 0], [], []>} : vector<512x32xbf16>, vector<64x32xbf16>, vector<512x64xf32> -> vector<512x64xf32>
    %c0_3 = arith.constant 0 : index
    %c0_4 = arith.constant 0 : index
    %4 = vector.load %arg3[%c0_3, %c0_4] : memref<1x64xf32, #tpu.memory_space<vmem>>, vector<1x64xf32>
    %5 = vector.broadcast %4 : vector<1x64xf32> to vector<512x64xf32>
    %6 = arith.addf %3, %5 : vector<512x64xf32>
    %cst_5 = arith.constant 0.000000e+00 : f32
    %7 = vector.broadcast %cst_5 : f32 to vector<512x64xf32>
    %8 = arith.maximumf %6, %7 : vector<512x64xf32>
    %9 = arith.truncf %8 : vector<512x64xf32> to vector<512x64xbf16>
    %c0_6 = arith.constant 0 : index
    %c0_7 = arith.constant 0 : index
    %10 = vector.load %arg4[%c0_6, %c0_7] : memref<16x64xbf16, #tpu.memory_space<vmem>>, vector<16x64xbf16>
    %cst_8 = arith.constant dense<0.000000e+00> : vector<512x16xf32>
    %11 = tpu.matmul %9, %10, %cst_8 {dimension_numbers = #tpu.dot_dimension_numbers<[1], [1], [0], [0], [0, 0, 1, 0], [], []>} : vector<512x64xbf16>, vector<16x64xbf16>, vector<512x16xf32> -> vector<512x16xf32>
    %c0_9 = arith.constant 0 : index
    %c0_10 = arith.constant 0 : index
    %12 = vector.load %arg5[%c0_9, %c0_10] : memref<1x16xf32, #tpu.memory_space<vmem>>, vector<1x16xf32>
    %13 = vector.broadcast %12 : vector<1x16xf32> to vector<512x16xf32>
    %14 = arith.addf %11, %13 : vector<512x16xf32>
    %c0_11 = arith.constant 0 : index
    %c0_12 = arith.constant 0 : index
    %15 = vector.load %arg6[%c0_11, %c0_12] : memref<512x16xf32, #tpu.memory_space<vmem>>, vector<512x16xf32>
    tpu.vector_store %arg6[%c0_11, %c0_12], %14 {strides = array<i32>} : memref<512x16xf32, #tpu.memory_space<vmem>>, vector<512x16xf32>,
    return
  }
  func.func @transform_0(%arg0: i32) -> (i32, i32) {
    %c0_i32 = arith.constant 0 : i32
    %c0_i32_0 = arith.constant 0 : i32
    return %arg0, %c0_i32 : i32, i32
  }
  func.func @transform_1(%arg0: i32) -> (i32, i32) {
    %c0_i32 = arith.constant 0 : i32
    %c0_i32_0 = arith.constant 0 : i32
    %c0_i32_1 = arith.constant 0 : i32
    return %c0_i32, %c0_i32_0 : i32, i32
  }
  func.func @transform_2(%arg0: i32) -> (i32, i32) {
    %c0_i32 = arith.constant 0 : i32
    %c0_i32_0 = arith.constant 0 : i32
    %c0_i32_1 = arith.constant 0 : i32
    return %c0_i32, %c0_i32_0 : i32, i32
  }
  func.func @transform_3(%arg0: i32) -> (i32, i32) {
    %c0_i32 = arith.constant 0 : i32
    %c0_i32_0 = arith.constant 0 : i32
    %c0_i32_1 = arith.constant 0 : i32
    return %c0_i32, %c0_i32_0 : i32, i32
  }
  func.func @transform_4(%arg0: i32) -> (i32, i32) {
    %c0_i32 = arith.constant 0 : i32
    %c0_i32_0 = arith.constant 0 : i32
    %c0_i32_1 = arith.constant 0 : i32
    return %c0_i32, %c0_i32_0 : i32, i32
  }
  func.func @transform_5(%arg0: i32) -> (i32, i32) {
    %c0_i32 = arith.constant 0 : i32
    %c0_i32_0 = arith.constant 0 : i32
    return %arg0, %c0_i32 : i32, i32
  }
}

</mosaic_0001>

<bundles_post_ra>
// kernel: _linear_autoencoder_impl.1
= control target key start
LH: loop header
LB: loop body
LE: loop exit
PB: predicated region body
PF: predicated region fallthrough
CT: control target
= control target key end

     0   :  { %s1285_s18 = smov 0   ;;  %s1730_s0 = inlined_call_operand.vmem [shape: f32[1024,32], index: 0, kind: input, shape index: {}]   ;;  %s1731_s1 = inlined_call_operand.vmem [shape: bf16[64,32], index: 1, kind: input, shape index: {}]   ;;  %s1732_s2 = inlined_call_operand.vmem [shape: f32[1,64], index: 2, kind: input, shape index: {}]   ;;  %s1733_s3 = inlined_call_operand.vmem [shape: bf16[16,64], index: 3, kind: input, shape index: {}]   ;;  %s1734_s4 = inlined_call_operand.vmem [shape: f32[1,16], index: 4, kind: input, shape index: {}]   ;;  %s1735_s5 = inlined_call_operand.vmem [shape: f32[1024,16], index: 5, kind: output, shape index: {}]  }
   0x1 LB: > { %s1132_s19 = sadd.s32 4294967295, %s1253_s18   ;;  %p1136_p0 = scmp.ge.s32.totalorder %s1253_s18, 1  ;;  %s1253_s18 = sphi %s1285_s18, %s15_s18  }
   0x2   : > { %p188_p1 = scmp.lt.s32.totalorder %s1253_s18, 3 }
   0x4   : > { %p189_p2 = pnand %p1136_p0, %p188_p1 }
   0x5   : > { %s1137_s24 = sshll.u32 (!%p189_p2), %s1132_s19, 6 }
   0x6   : > { %192 = sbr.rel (%p189_p2) target bundleno = 577 (0x241), region = 40  ;;  %p217_p3 = scmp.lt.s32.totalorder (!%p189_p2), %s1137_s24, 127 }
   0xb   : > { %v1230_v0 = vld [vmem:[%s1731_s1 + $0x18] sm:$0xff]  ;;  %vm357_vm0 = vcmask 261120   ;;  %v1229_v2 = vld [vmem:[%s1731_s1 + $0x10] sm:$0xff]  ;;  %v1228_v4 = vld [vmem:[%s1731_s1 + $0x8] sm:$0xff]  ;;  %s1737_s24 = smov (!%p217_p3, %s1137_s24), 127  ;;  %vm742_vm1 = vcmask 523264  }
   0xc   : > { %v464_v1 = vsel %vm357_vm0, %v1230_v0, 0  ;;  %v461_v3 = vsel %vm357_vm0, %v1229_v2, 0  ;;  %v458_v5 = vsel %vm357_vm0, %v1228_v4, 0  ;;  %v1227_v6 = vld [vmem:[%s1731_s1] sm:$0xff]  ;;  %s1138_s29 = sshll.u32 %s1737_s24, 3  ;;  %vm1011_vm2 = vcmask 130048  }
   0xd   : > { %470 = vmatpush.bf16.xpose.msra.mxu0 %v464_v1  ;;  %1232 = vmatpush.bf16.xpose.msra.mxu2 %v464_v1  ;;  %s1316_s7 = scalar_lea.vmem %s1730_s0, %s1138_s29  ;;  %v455_v7 = vsel %vm357_vm0, %v1227_v6, 0  ;;  %v1231_v50 = vld [vmem:[%s1733_s3] sm:$0xff]  ;;  %s1485_s16 = scalar_lea.vmem %s1735_s5, %s1138_s29 }
   0xe   : > { %v229_v8 = vld [vmem:[%s1316_s7] sm:$0xff]  ;;  %v230_v9 = vld [vmem:[%s1316_s7 + $0x8] sm:$0xff]  ;;  %v231_v14 = vld [vmem:[%s1316_s7 + $0x10] sm:$0xff]  ;;  %v840_v51 = vsel %vm742_vm1, %v1231_v50, 0 }
   0xf   : > { %v261_v10 = vld [vmem:[%s1316_s7 + $0x100] sm:$0xff]  ;;  %v262_v11 = vld [vmem:[%s1316_s7 + $0x108] sm:$0xff]  ;;  %v293_v12 = vpack.c.bf16 %v230_v9, %v229_v8  ;;  %v232_v15 = vld [vmem:[%s1316_s7 + $0x18] sm:$0xff]  ;;  %849 = vmatpush.bf16.xpose.msra.mxu1 %v840_v51  ;;  %1236 = vmatpush.bf16.xpose.msra.mxu3 %v840_v51 }
  0x10   : > { %v309_v13 = vpack.c.bf16 %v262_v11, %v261_v10  ;;  %v263_v16 = vld [vmem:[%s1316_s7 + $0x110] sm:$0xff]  ;;  %v264_v17 = vld [vmem:[%s1316_s7 + $0x118] sm:$0xff]  ;;  %v294_v18 = vpack.c.bf16 %v232_v15, %v231_v14  ;;  %v233_v20 = vld [vmem:[%s1316_s7 + $0x20] sm:$0xff] }
  0x11   : > { %v310_v19 = vpack.c.bf16 %v264_v17, %v263_v16  ;;  %v234_v21 = vld [vmem:[%s1316_s7 + $0x28] sm:$0xff]  ;;  %v265_v22 = vld [vmem:[%s1316_s7 + $0x120] sm:$0xff]  ;;  %v235_v26 = vld [vmem:[%s1316_s7 + $0x30] sm:$0xff] }
  0x12   : > { %v266_v23 = vld [vmem:[%s1316_s7 + $0x128] sm:$0xff]  ;;  %v295_v24 = vpack.c.bf16 %v234_v21, %v233_v20  ;;  %v236_v27 = vld [vmem:[%s1316_s7 + $0x38] sm:$0xff]  ;;  %v267_v28 = vld [vmem:[%s1316_s7 + $0x130] sm:$0xff] }
  0x13   : > { %v311_v25 = vpack.c.bf16 %v266_v23, %v265_v22  ;;  %v268_v29 = vld [vmem:[%s1316_s7 + $0x138] sm:$0xff]  ;;  %v296_v30 = vpack.c.bf16 %v236_v27, %v235_v26  ;;  %v237_v32 = vld [vmem:[%s1316_s7 + $0x40] sm:$0xff]  ;;  %v238_v33 = vld [vmem:[%s1316_s7 + $0x48] sm:$0xff] }
  0x14   : > { %v312_v31 = vpack.c.bf16 %v268_v29, %v267_v28  ;;  %v269_v34 = vld [vmem:[%s1316_s7 + $0x140] sm:$0xff]  ;;  %v270_v35 = vld [vmem:[%s1316_s7 + $0x148] sm:$0xff]  ;;  %v297_v36 = vpack.c.bf16 %v238_v33, %v237_v32  ;;  %v239_v38 = vld [vmem:[%s1316_s7 + $0x50] sm:$0xff] }
  0x15   : > { %471 = vmatpush.bf16.xpose.msra.mxu0 %v461_v3  ;;  %1233 = vmatpush.bf16.xpose.msra.mxu2 %v461_v3  ;;  %v313_v37 = vpack.c.bf16 %v270_v35, %v269_v34  ;;  %v240_v39 = vld [vmem:[%s1316_s7 + $0x58] sm:$0xff]  ;;  %v271_v40 = vld [vmem:[%s1316_s7 + $0x150] sm:$0xff]  ;;  %v241_v44 = vld [vmem:[%s1316_s7 + $0x60] sm:$0xff] }
  0x16   : > { %v272_v41 = vld [vmem:[%s1316_s7 + $0x158] sm:$0xff]  ;;  %v298_v42 = vpack.c.bf16 %v240_v39, %v239_v38  ;;  %v242_v45 = vld [vmem:[%s1316_s7 + $0x68] sm:$0xff]  ;;  %v273_v46 = vld [vmem:[%s1316_s7 + $0x160] sm:$0xff] }
  0x17   : > { %v314_v43 = vpack.c.bf16 %v272_v41, %v271_v40  ;;  %v274_v47 = vld [vmem:[%s1316_s7 + $0x168] sm:$0xff]  ;;  %v299_v48 = vpack.c.bf16 %v242_v45, %v241_v44  ;;  %v243_v52 = vld [vmem:[%s1316_s7 + $0x70] sm:$0xff]  ;;  %v244_v53 = vld [vmem:[%s1316_s7 + $0x78] sm:$0xff] }
  0x18   : > { %v315_v49 = vpack.c.bf16 %v274_v47, %v273_v46  ;;  %v275_v54 = vld [vmem:[%s1316_s7 + $0x170] sm:$0xff]  ;;  %v276_v55 = vld [vmem:[%s1316_s7 + $0x178] sm:$0xff]  ;;  %v300_v56 = vpack.c.bf16 %v244_v53, %v243_v52  ;;  %v245_v58 = vld [vmem:[%s1316_s7 + $0x80] sm:$0xff] }
  0x19   : > { %v316_v57 = vpack.c.bf16 %v276_v55, %v275_v54  ;;  %v246_v59 = vld [vmem:[%s1316_s7 + $0x88] sm:$0xff]  ;;  %v277_v60 = vld [vmem:[%s1316_s7 + $0x180] sm:$0xff]  ;;  %v247_v8 = vld [vmem:[%s1316_s7 + $0x90] sm:$0xff] }
  0x1a   : > { %v278_v61 = vld [vmem:[%s1316_s7 + $0x188] sm:$0xff]  ;;  %v301_v62 = vpack.c.bf16 %v246_v59, %v245_v58  ;;  %v1378_v1 = vld [vmem:[%s1732_s2] ss:$0 sm:$0xff]  ;;  %v248_v9 = vld [vmem:[%s1316_s7 + $0x98] sm:$0xff] }
  0x1b   : > { %v317_v63 = vpack.c.bf16 %v278_v61, %v277_v60  ;;  %v279_v10 = vld [vmem:[%s1316_s7 + $0x190] sm:$0xff]  ;;  %v280_v11 = vld [vmem:[%s1316_s7 + $0x198] sm:$0xff]  ;;  %v302_v16 = vpack.c.bf16 %v248_v9, %v247_v8  ;;  %v249_v28 = vld [vmem:[%s1316_s7 + $0xa0] sm:$0xff] }
  0x1c   : > { %v318_v17 = vpack.c.bf16 %v280_v11, %v279_v10  ;;  %v250_v29 = vld [vmem:[%s1316_s7 + $0xa8] sm:$0xff]  ;;  %v283_v50 = vld [vmem:[%s1316_s7 + $0x1b0] sm:$0xff]  ;;  %v284_v51 = vld [vmem:[%s1316_s7 + $0x1b8] sm:$0xff] }
  0x1d   : > { %472 = vmatpush.bf16.xpose.msra.mxu0 %v458_v5  ;;  %1234 = vmatpush.bf16.xpose.msra.mxu2 %v458_v5  ;;  %v286_v8 = vld [vmem:[%s1316_s7 + $0x1c8] sm:$0xff] }
  0x25   : > { %473 = vmatpush.bf16.xpose.msra.mxu0 %v455_v7  ;;  %1235 = vmatpush.bf16.xpose.msra.mxu2 %v455_v7 }
  0x2c   : > { %1157 = vmatmul.msk.bf16.vlgmr.msra.gmra.mxu0 %vm357_vm0, %v293_v12  ;;  %1173 = vmatmul.msk.bf16.vlgmr.msra.gmra.mxu2 %vm357_vm0, %v309_v13 }
  0x3c   : > { %1158 = vmatmul.msk.bf16.gmra.mxu0 %vm357_vm0, %v294_v18  ;;  %1174 = vmatmul.msk.bf16.gmra.mxu2 %vm357_vm0, %v310_v19 }
  0x4c   : > { %1159 = vmatmul.msk.bf16.gmra.mxu0 %vm357_vm0, %v295_v24  ;;  %1175 = vmatmul.msk.bf16.gmra.mxu2 %vm357_vm0, %v311_v25 }
  0x5c   : > { %1160 = vmatmul.msk.bf16.gmra.mxu0 %vm357_vm0, %v296_v30  ;;  %1176 = vmatmul.msk.bf16.gmra.mxu2 %vm357_vm0, %v312_v31  ;;  %v281_v30 = vld [vmem:[%s1316_s7 + $0x1a0] sm:$0xff]  ;;  %v282_v31 = vld [vmem:[%s1316_s7 + $0x1a8] sm:$0xff] }
  0x6c   : > { %1161 = vmatmul.msk.bf16.gmra.mxu0 %vm357_vm0, %v297_v36  ;;  %1177 = vmatmul.msk.bf16.gmra.mxu2 %vm357_vm0, %v313_v37  ;;  %v303_v36 = vpack.c.bf16 %v250_v29, %v249_v28  ;;  %v319_v37 = vpack.c.bf16 %v282_v31, %v281_v30  ;;  %v287_v28 = vld [vmem:[%s1316_s7 + $0x1d0] sm:$0xff]  ;;  %v288_v29 = vld [vmem:[%s1316_s7 + $0x1d8] sm:$0xff] }
  0x7c   : > { %1162 = vmatmul.msk.bf16.gmra.mxu0 %vm357_vm0, %v298_v42  ;;  %1178 = vmatmul.msk.bf16.gmra.mxu2 %vm357_vm0, %v314_v43 }
  0x8c   : > { %1163 = vmatmul.msk.bf16.gmra.mxu0 %vm357_vm0, %v299_v48  ;;  %1179 = vmatmul.msk.bf16.gmra.mxu2 %vm357_vm0, %v315_v49  ;;  %v251_v48 = vld [vmem:[%s1316_s7 + $0xb0] sm:$0xff]  ;;  %v252_v49 = vld [vmem:[%s1316_s7 + $0xb8] sm:$0xff] }
  0x9c   : > { %1164 = vmatmul.msk.bf16.gmra.mxu0 %vm357_vm0, %v300_v56  ;;  %1180 = vmatmul.msk.bf16.gmra.mxu2 %vm357_vm0, %v316_v57  ;;  %v304_v56 = vpack.c.bf16 %v252_v49, %v251_v48  ;;  %v320_v57 = vpack.c.bf16 %v284_v51, %v283_v50  ;;  %v289_v48 = vld [vmem:[%s1316_s7 + $0x1e0] sm:$0xff]  ;;  %v290_v49 = vld [vmem:[%s1316_s7 + $0x1e8] sm:$0xff] }
  0xa9   : > { %v475_v0 = vpop.f32.mrf.mxu0 }
  0xaa   : > { %v476_v3 = vadd.f32 %v1378_v1, %v475_v0 }
  0xac   : > { %1165 = vmatmul.msk.bf16.gmra.mxu0 %vm357_vm0, %v301_v62  ;;  %1181 = vmatmul.msk.bf16.gmra.mxu2 %vm357_vm0, %v317_v63  ;;  %v635_v6 = vmax.f32 %v476_v3, 0.0 }
  0xaf   : > { %v555_v2 = vpop.f32.mrf.mxu2 }
  0xb0   : > { %v556_v12 = vadd.f32 %v1378_v1, %v555_v2 }
  0xb1   : > { %v477_v4 = vpop.f32.mrf.mxu0 }
  0xb2   : > { %v478_v5 = vadd.f32 %v1378_v1, %v477_v4  ;;  %v667_v19 = vmax.f32 %v556_v12, 0.0 }
  0xb4   : > { %v636_v7 = vmax.f32 %v478_v5, 0.0  ;;  %v253_v5 = vld [vmem:[%s1316_s7 + $0xc0] sm:$0xff] }
  0xb6   : > { %v699_v13 = vpack.c.bf16 %v636_v7, %v635_v6  ;;  %v254_v6 = vld [vmem:[%s1316_s7 + $0xc8] sm:$0xff]  ;;  %v285_v7 = vld [vmem:[%s1316_s7 + $0x1c0] sm:$0xff] }
  0xb7   : > { %v557_v14 = vpop.f32.mrf.mxu2 }
  0xb8   : > { %v558_v15 = vadd.f32 %v1378_v1, %v557_v14  ;;  %1193 = vmatmul.msk.bf16.vlgmr.msra.gmra.mxu1 %vm742_vm1, %v699_v13  ;;  %v305_v13 = vpack.c.bf16 %v254_v6, %v253_v5  ;;  %v321_v14 = vpack.c.bf16 %v286_v8, %v285_v7  ;;  %v291_v5 = vld [vmem:[%s1316_s7 + $0x1f0] sm:$0xff]  ;;  %v292_v6 = vld [vmem:[%s1316_s7 + $0x1f8] sm:$0xff] }
  0xb9   : > { %v480_v18 = vpop.f32.mrf.mxu0 }
  0xba   : > { %v668_v20 = vmax.f32 %v558_v15, 0.0  ;;  %v481_v23 = vadd.f32 %v1378_v1, %v480_v18 }
  0xbc   : > { %v1391_v21 = vpack.c.bf16 %v668_v20, %v667_v19  ;;  %1166 = vmatmul.msk.bf16.gmra.mxu0 %vm357_vm0, %v302_v16  ;;  %1182 = vmatmul.msk.bf16.gmra.mxu2 %vm357_vm0, %v318_v17  ;;  %v637_v26 = vmax.f32 %v481_v23, 0.0 }
  0xbf   : > { %v560_v22 = vpop.f32.mrf.mxu2 }
  0xc0   : > { %v561_v32 = vadd.f32 %v1378_v1, %v560_v22 }
  0xc1   : > { %v482_v24 = vpop.f32.mrf.mxu0 }
  0xc2   : > { %v483_v25 = vadd.f32 %v1378_v1, %v482_v24  ;;  %v669_v39 = vmax.f32 %v561_v32, 0.0 }
  0xc4   : > { %v638_v27 = vmax.f32 %v483_v25, 0.0 }
  0xc6   : > { %v700_v33 = vpack.c.bf16 %v638_v27, %v637_v26  ;;  %v255_v26 = vld [vmem:[%s1316_s7 + $0xd0] sm:$0xff]  ;;  %v256_v27 = vld [vmem:[%s1316_s7 + $0xd8] sm:$0xff] }
  0xc7   : > { %v562_v34 = vpop.f32.mrf.mxu2 }
  0xc8   : > { %v563_v35 = vadd.f32 %v1378_v1, %v562_v34  ;;  %1194 = vmatmul.msk.bf16.gmra.mxu1 %vm742_vm1, %v700_v33  ;;  %v306_v34 = vpack.c.bf16 %v256_v27, %v255_v26 }
  0xc9   : > { %v485_v38 = vpop.f32.mrf.mxu0 }
  0xca   : > { %v670_v40 = vmax.f32 %v563_v35, 0.0  ;;  %v486_v43 = vadd.f32 %v1378_v1, %v485_v38  ;;  %v322_v35 = vpack.c.bf16 %v288_v29, %v287_v28 }
  0xcc   : > { %1167 = vmatmul.msk.bf16.gmra.mxu0 %vm357_vm0, %v303_v36  ;;  %1183 = vmatmul.msk.bf16.gmra.mxu2 %vm357_vm0, %v319_v37  ;;  %v716_v41 = vpack.c.bf16 %v670_v40, %v669_v39  ;;  %v639_v46 = vmax.f32 %v486_v43, 0.0 }
  0xce   : > { %1210 = vmatmul.msk.bf16.vlgmr.msra.gmra.mxu3 %vm742_vm1, %v716_v41 }
  0xcf   : > { %v565_v42 = vpop.f32.mrf.mxu2 }
  0xd0   : > { %v566_v52 = vadd.f32 %v1378_v1, %v565_v42 }
  0xd1   : > { %v487_v44 = vpop.f32.mrf.mxu0 }
  0xd2   : > { %v488_v45 = vadd.f32 %v1378_v1, %v487_v44  ;;  %v671_v59 = vmax.f32 %v566_v52, 0.0 }
  0xd4   : > { %v640_v47 = vmax.f32 %v488_v45, 0.0 }
  0xd6   : > { %v701_v53 = vpack.c.bf16 %v640_v47, %v639_v46  ;;  %v257_v46 = vld [vmem:[%s1316_s7 + $0xe0] sm:$0xff]  ;;  %v258_v47 = vld [vmem:[%s1316_s7 + $0xe8] sm:$0xff] }
  0xd7   : > { %v567_v54 = vpop.f32.mrf.mxu2 }
  0xd8   : > { %v568_v55 = vadd.f32 %v1378_v1, %v567_v54  ;;  %1195 = vmatmul.msk.bf16.gmra.mxu1 %vm742_vm1, %v701_v53  ;;  %v307_v54 = vpack.c.bf16 %v258_v47, %v257_v46 }
  0xd9   : > { %v490_v58 = vpop.f32.mrf.mxu0 }
  0xda   : > { %v672_v60 = vmax.f32 %v568_v55, 0.0  ;;  %v491_v63 = vadd.f32 %v1378_v1, %v490_v58  ;;  %v323_v55 = vpack.c.bf16 %v290_v49, %v289_v48 }
  0xdc   : > { %1168 = vmatmul.msk.bf16.gmra.mxu0 %vm357_vm0, %v304_v56  ;;  %1184 = vmatmul.msk.bf16.gmra.mxu2 %vm357_vm0, %v320_v57  ;;  %v717_v61 = vpack.c.bf16 %v672_v60, %v671_v59  ;;  %v641_v3 = vmax.f32 %v491_v63, 0.0 }
  0xde   : > { %1211 = vmatmul.msk.bf16.gmra.mxu3 %vm742_vm1, %v717_v61 }
  0xdf   : > { %v570_v62 = vpop.f32.mrf.mxu2 }
  0xe0   : > { %v571_v9 = vadd.f32 %v1378_v1, %v570_v62 }
  0xe1   : > { %v492_v0 = vpop.f32.mrf.mxu0 }
  0xe2   : > { %v493_v2 = vadd.f32 %v1378_v1, %v492_v0  ;;  %v673_v16 = vmax.f32 %v571_v9, 0.0 }
  0xe4   : > { %v642_v4 = vmax.f32 %v493_v2, 0.0 }
  0xe6   : > { %v702_v10 = vpack.c.bf16 %v642_v4, %v641_v3  ;;  %v259_v3 = vld [vmem:[%s1316_s7 + $0xf0] sm:$0xff]  ;;  %v260_v4 = vld [vmem:[%s1316_s7 + $0xf8] sm:$0xff] }
  0xe7   : > { %v572_v11 = vpop.f32.mrf.mxu2 }
  0xe8   : > { %v573_v12 = vadd.f32 %v1378_v1, %v572_v11  ;;  %1196 = vmatmul.msk.bf16.gmra.mxu1 %vm742_vm1, %v702_v10  ;;  %v308_v11 = vpack.c.bf16 %v260_v4, %v259_v3 }
  0xe9   : > { %v495_v15 = vpop.f32.mrf.mxu0 }
  0xea   : > { %v674_v17 = vmax.f32 %v573_v12, 0.0  ;;  %v496_v20 = vadd.f32 %v1378_v1, %v495_v15  ;;  %v324_v12 = vpack.c.bf16 %v292_v6, %v291_v5 }
  0xec   : > { %1169 = vmatmul.msk.bf16.gmra.mxu0 %vm357_vm0, %v305_v13  ;;  %1185 = vmatmul.msk.bf16.gmra.mxu2 %vm357_vm0, %v321_v14  ;;  %v718_v18 = vpack.c.bf16 %v674_v17, %v673_v16  ;;  %v643_v24 = vmax.f32 %v496_v20, 0.0 }
  0xee   : > { %1212 = vmatmul.msk.bf16.gmra.mxu3 %vm742_vm1, %v718_v18 }
  0xef   : > { %v575_v19 = vpop.f32.mrf.mxu2 }
  0xf0   : > { %v576_v30 = vadd.f32 %v1378_v1, %v575_v19 }
  0xf1   : > { %v497_v22 = vpop.f32.mrf.mxu0 }
  0xf2   : > { %v498_v23 = vadd.f32 %v1378_v1, %v497_v22  ;;  %v675_v37 = vmax.f32 %v576_v30, 0.0 }
  0xf4   : > { %v644_v25 = vmax.f32 %v498_v23, 0.0 }
  0xf6   : > { %v703_v31 = vpack.c.bf16 %v644_v25, %v643_v24 }
  0xf7   : > { %v577_v32 = vpop.f32.mrf.mxu2 }
  0xf8   : > { %v578_v33 = vadd.f32 %v1378_v1, %v577_v32  ;;  %1197 = vmatmul.msk.bf16.gmra.mxu1 %vm742_vm1, %v703_v31 }
  0xf9   : > { %v500_v36 = vpop.f32.mrf.mxu0 }
  0xfa   : > { %v676_v38 = vmax.f32 %v578_v33, 0.0  ;;  %v501_v41 = vadd.f32 %v1378_v1, %v500_v36  ;;  %v1478_v36 = vld [vmem:[%s1734_s4] ss:$0 sm:$0xff] }
  0xfc   : > { %v719_v39 = vpack.c.bf16 %v676_v38, %v675_v37  ;;  %1170 = vmatmul.msk.bf16.gmra.mxu0 %vm357_vm0, %v306_v34  ;;  %1186 = vmatmul.msk.bf16.gmra.mxu2 %vm357_vm0, %v322_v35  ;;  %v645_v44 = vmax.f32 %v501_v41, 0.0 }
  0xfe   : > { %1213 = vmatmul.msk.bf16.gmra.mxu3 %vm742_vm1, %v719_v39 }
  0xff   : > { %v580_v40 = vpop.f32.mrf.mxu2 }
 0x100   : > { %v581_v50 = vadd.f32 %v1378_v1, %v580_v40 }
 0x101   : > { %v502_v42 = vpop.f32.mrf.mxu0 }
 0x102   : > { %v503_v43 = vadd.f32 %v1378_v1, %v502_v42  ;;  %v677_v57 = vmax.f32 %v581_v50, 0.0 }
 0x104   : > { %v646_v45 = vmax.f32 %v503_v43, 0.0 }
 0x106   : > { %v704_v51 = vpack.c.bf16 %v646_v45, %v645_v44 }
 0x107   : > { %v582_v52 = vpop.f32.mrf.mxu2 }
 0x108   : > { %v583_v53 = vadd.f32 %v1378_v1, %v582_v52  ;;  %1198 = vmatmul.msk.bf16.gmra.mxu1 %vm742_vm1, %v704_v51 }
 0x109   : > { %v505_v56 = vpop.f32.mrf.mxu0 }
 0x10a   : > { %v678_v58 = vmax.f32 %v583_v53, 0.0  ;;  %v506_v61 = vadd.f32 %v1378_v1, %v505_v56 }
 0x10c   : > { %v720_v59 = vpack.c.bf16 %v678_v58, %v677_v57  ;;  %1171 = vmatmul.msk.bf16.gmra.mxu0 %vm357_vm0, %v307_v54  ;;  %1187 = vmatmul.msk.bf16.gmra.mxu2 %vm357_vm0, %v323_v55  ;;  %v647_v0 = vmax.f32 %v506_v61, 0.0 }
 0x10e   : > { %1214 = vmatmul.msk.bf16.gmra.mxu3 %vm742_vm1, %v720_v59 }
 0x10f   : > { %v585_v60 = vpop.f32.mrf.mxu2 }
 0x110   : > { %v586_v7 = vadd.f32 %v1378_v1, %v585_v60 }
 0x111   : > { %v507_v62 = vpop.f32.mrf.mxu0 }
 0x112   : > { %v508_v63 = vadd.f32 %v1378_v1, %v507_v62  ;;  %v679_v14 = vmax.f32 %v586_v7, 0.0 }
 0x114   : > { %v648_v2 = vmax.f32 %v508_v63, 0.0 }
 0x116   : > { %v705_v8 = vpack.c.bf16 %v648_v2, %v647_v0 }
 0x117   : > { %v587_v9 = vpop.f32.mrf.mxu2 }
 0x118   : > { %v588_v10 = vadd.f32 %v1378_v1, %v587_v9  ;;  %1199 = vmatmul.msk.bf16.gmra.mxu1 %vm742_vm1, %v705_v8 }
 0x119   : > { %v510_v13 = vpop.f32.mrf.mxu0 }
 0x11a   : > { %v680_v15 = vmax.f32 %v588_v10, 0.0  ;;  %v511_v18 = vadd.f32 %v1378_v1, %v510_v13 }
 0x11c   : > { %v721_v16 = vpack.c.bf16 %v680_v15, %v679_v14  ;;  %1172 = vmatmul.msk.bf16.gmra.mxu0 %vm357_vm0, %v308_v11  ;;  %1188 = vmatmul.msk.bf16.gmra.mxu2 %vm357_vm0, %v324_v12  ;;  %v649_v22 = vmax.f32 %v511_v18, 0.0 }
 0x11e   : > { %1215 = vmatmul.msk.bf16.gmra.mxu3 %vm742_vm1, %v721_v16 }
 0x11f   : > { %v590_v17 = vpop.f32.mrf.mxu2 }
 0x120   : > { %v591_v24 = vadd.f32 %v1378_v1, %v590_v17 }
 0x121   : > { %v512_v19 = vpop.f32.mrf.mxu0 }
 0x122   : > { %v513_v20 = vadd.f32 %v1378_v1, %v512_v19  ;;  %v681_v29 = vmax.f32 %v591_v24, 0.0 }
 0x124   : > { %v650_v23 = vmax.f32 %v513_v20, 0.0 }
 0x126   : > { %v706_v25 = vpack.c.bf16 %v650_v23, %v649_v22 }
 0x127   : > { %v592_v26 = vpop.f32.mrf.mxu2 }
 0x128   : > { %v593_v27 = vadd.f32 %v1378_v1, %v592_v26  ;;  %1200 = vmatmul.msk.bf16.gmra.mxu1 %vm742_vm1, %v706_v25 }
 0x129   : > { %v515_v28 = vpop.f32.mrf.mxu0 }
 0x12a   : > { %v682_v30 = vmax.f32 %v593_v27, 0.0  ;;  %v516_v33 = vadd.f32 %v1378_v1, %v515_v28 }
 0x12c   : > { %v722_v31 = vpack.c.bf16 %v682_v30, %v681_v29  ;;  %v651_v37 = vmax.f32 %v516_v33, 0.0 }
 0x12e   : > { %1216 = vmatmul.msk.bf16.gmra.mxu3 %vm742_vm1, %v722_v31 }
 0x12f   : > { %v595_v32 = vpop.f32.mrf.mxu2 }
 0x130   : > { %v596_v40 = vadd.f32 %v1378_v1, %v595_v32 }
 0x131   : > { %v517_v34 = vpop.f32.mrf.mxu0 }
 0x132   : > { %v518_v35 = vadd.f32 %v1378_v1, %v517_v34  ;;  %v683_v46 = vmax.f32 %v596_v40, 0.0 }
 0x134   : > { %v652_v38 = vmax.f32 %v518_v35, 0.0 }
 0x135   : > { %v851_v39 = vpop.f32.mrf.mxu1 }
 0x136   : > { %v707_v41 = vpack.c.bf16 %v652_v38, %v651_v37  ;;  %v852_v42 = vadd.f32 %v1478_v36, %v851_v39 }
 0x137   : > { %v597_v43 = vpop.f32.mrf.mxu2 }
 0x138   : > { %1012 = vst.msk [vmem:[%s1485_s16] sm:$0xff] %vm1011_vm2, %v852_v42  ;;  %v598_v44 = vadd.f32 %v1378_v1, %v597_v43  ;;  %1201 = vmatmul.msk.bf16.gmra.mxu1 %vm742_vm1, %v707_v41 }
 0x139   : > { %v520_v45 = vpop.f32.mrf.mxu0 }
 0x13a   : > { %v684_v47 = vmax.f32 %v598_v44, 0.0  ;;  %v521_v52 = vadd.f32 %v1378_v1, %v520_v45 }
 0x13c   : > { %v723_v48 = vpack.c.bf16 %v684_v47, %v683_v46  ;;  %v653_v55 = vmax.f32 %v521_v52, 0.0 }
 0x13d   : > { %v853_v49 = vpop.f32.mrf.mxu1 }
 0x13e   : > { %v854_v50 = vadd.f32 %v1478_v36, %v853_v49  ;;  %1217 = vmatmul.msk.bf16.gmra.mxu3 %vm742_vm1, %v723_v48 }
 0x13f   : > { %v600_v51 = vpop.f32.mrf.mxu2 }
 0x140   : > { %1013 = vst.msk [vmem:[%s1485_s16 + $0x8] sm:$0xff] %vm1011_vm2, %v854_v50  ;;  %v601_v58 = vadd.f32 %v1378_v1, %v600_v51 }
 0x141   : > { %v522_v53 = vpop.f32.mrf.mxu0 }
 0x142   : > { %v523_v54 = vadd.f32 %v1378_v1, %v522_v53  ;;  %v685_v0 = vmax.f32 %v601_v58, 0.0 }
 0x144   : > { %v654_v56 = vmax.f32 %v523_v54, 0.0 }
 0x145   : > { %v856_v57 = vpop.f32.mrf.mxu1 }
 0x146   : > { %v708_v59 = vpack.c.bf16 %v654_v56, %v653_v55  ;;  %v857_v60 = vadd.f32 %v1478_v36, %v856_v57 }
 0x147   : > { %v602_v61 = vpop.f32.mrf.mxu2 }
 0x148   : > { %1014 = vst.msk [vmem:[%s1485_s16 + $0x10] sm:$0xff] %vm1011_vm2, %v857_v60  ;;  %v603_v62 = vadd.f32 %v1378_v1, %v602_v61  ;;  %1202 = vmatmul.msk.bf16.gmra.mxu1 %vm742_vm1, %v708_v59 }
 0x149   : > { %v525_v63 = vpop.f32.mrf.mxu0 }
 0x14a   : > { %v686_v2 = vmax.f32 %v603_v62, 0.0  ;;  %v526_v7 = vadd.f32 %v1378_v1, %v525_v63 }
 0x14c   : > { %v724_v3 = vpack.c.bf16 %v686_v2, %v685_v0  ;;  %v655_v12 = vmax.f32 %v526_v7, 0.0 }
 0x14d   : > { %v858_v4 = vpop.f32.mrf.mxu1 }
 0x14e   : > { %v859_v5 = vadd.f32 %v1478_v36, %v858_v4  ;;  %1218 = vmatmul.msk.bf16.gmra.mxu3 %vm742_vm1, %v724_v3 }
 0x14f   : > { %v605_v6 = vpop.f32.mrf.mxu2 }
 0x150   : > { %1015 = vst.msk [vmem:[%s1485_s16 + $0x18] sm:$0xff] %vm1011_vm2, %v859_v5  ;;  %v606_v15 = vadd.f32 %v1378_v1, %v605_v6 }
 0x151   : > { %v527_v8 = vpop.f32.mrf.mxu0  ;;  %v936_v9 = vpop.f32.mrf.mxu3 }
 0x152   : > { %v528_v10 = vadd.f32 %v1378_v1, %v527_v8  ;;  %v937_v11 = vadd.f32 %v1478_v36, %v936_v9  ;;  %v687_v23 = vmax.f32 %v606_v15, 0.0 }
 0x154   : > { %v656_v13 = vmax.f32 %v528_v10, 0.0  ;;  %1046 = vst.msk [vmem:[%s1485_s16 + $0x110] sm:$0xff] %vm1011_vm2, %v937_v11 }
 0x155   : > { %v861_v14 = vpop.f32.mrf.mxu1 }
 0x156   : > { %v709_v16 = vpack.c.bf16 %v656_v13, %v655_v12  ;;  %v862_v17 = vadd.f32 %v1478_v36, %v861_v14 }
 0x157   : > { %v607_v18 = vpop.f32.mrf.mxu2 }
 0x158   : > { %1016 = vst.msk [vmem:[%s1485_s16 + $0x20] sm:$0xff] %vm1011_vm2, %v862_v17  ;;  %v608_v19 = vadd.f32 %v1378_v1, %v607_v18  ;;  %1203 = vmatmul.msk.bf16.gmra.mxu1 %vm742_vm1, %v709_v16 }
 0x159   : > { %v530_v20 = vpop.f32.mrf.mxu0  ;;  %v938_v22 = vpop.f32.mrf.mxu3 }
 0x15a   : > { %v688_v24 = vmax.f32 %v608_v19, 0.0  ;;  %v939_v25 = vadd.f32 %v1478_v36, %v938_v22  ;;  %v531_v30 = vadd.f32 %v1378_v1, %v530_v20 }
 0x15c   : > { %v725_v26 = vpack.c.bf16 %v688_v24, %v687_v23  ;;  %1047 = vst.msk [vmem:[%s1485_s16 + $0x118] sm:$0xff] %vm1011_vm2, %v939_v25  ;;  %v657_v35 = vmax.f32 %v531_v30, 0.0 }
 0x15d   : > { %v863_v27 = vpop.f32.mrf.mxu1 }
 0x15e   : > { %v864_v28 = vadd.f32 %v1478_v36, %v863_v27  ;;  %1219 = vmatmul.msk.bf16.gmra.mxu3 %vm742_vm1, %v725_v26 }
 0x15f   : > { %v610_v29 = vpop.f32.mrf.mxu2 }
 0x160   : > { %1017 = vst.msk [vmem:[%s1485_s16 + $0x28] sm:$0xff] %vm1011_vm2, %v864_v28  ;;  %v611_v39 = vadd.f32 %v1378_v1, %v610_v29 }
 0x161   : > { %v532_v31 = vpop.f32.mrf.mxu0  ;;  %v941_v32 = vpop.f32.mrf.mxu3 }
 0x162   : > { %v533_v33 = vadd.f32 %v1378_v1, %v532_v31  ;;  %v942_v34 = vadd.f32 %v1478_v36, %v941_v32  ;;  %v689_v46 = vmax.f32 %v611_v39, 0.0 }
 0x164   : > { %v658_v37 = vmax.f32 %v533_v33, 0.0  ;;  %1048 = vst.msk [vmem:[%s1485_s16 + $0x120] sm:$0xff] %vm1011_vm2, %v942_v34 }
 0x165   : > { %v866_v38 = vpop.f32.mrf.mxu1 }
 0x166   : > { %v710_v40 = vpack.c.bf16 %v658_v37, %v657_v35  ;;  %v867_v41 = vadd.f32 %v1478_v36, %v866_v38 }
 0x167   : > { %v612_v42 = vpop.f32.mrf.mxu2 }
 0x168   : > { %1018 = vst.msk [vmem:[%s1485_s16 + $0x30] sm:$0xff] %vm1011_vm2, %v867_v41  ;;  %v613_v43 = vadd.f32 %v1378_v1, %v612_v42  ;;  %1204 = vmatmul.msk.bf16.gmra.mxu1 %vm742_vm1, %v710_v40 }
 0x169   : > { %v535_v44 = vpop.f32.mrf.mxu0  ;;  %v943_v45 = vpop.f32.mrf.mxu3 }
 0x16a   : > { %v690_v47 = vmax.f32 %v613_v43, 0.0  ;;  %v944_v48 = vadd.f32 %v1478_v36, %v943_v45  ;;  %v536_v53 = vadd.f32 %v1378_v1, %v535_v44 }
 0x16c   : > { %v726_v49 = vpack.c.bf16 %v690_v47, %v689_v46  ;;  %1049 = vst.msk [vmem:[%s1485_s16 + $0x128] sm:$0xff] %vm1011_vm2, %v944_v48  ;;  %v659_v58 = vmax.f32 %v536_v53, 0.0 }
 0x16d   : > { %v868_v50 = vpop.f32.mrf.mxu1 }
 0x16e   : > { %v869_v51 = vadd.f32 %v1478_v36, %v868_v50  ;;  %1220 = vmatmul.msk.bf16.gmra.mxu3 %vm742_vm1, %v726_v49 }
 0x16f   : > { %v615_v52 = vpop.f32.mrf.mxu2 }
 0x170   : > { %1019 = vst.msk [vmem:[%s1485_s16 + $0x38] sm:$0xff] %vm1011_vm2, %v869_v51  ;;  %v616_v61 = vadd.f32 %v1378_v1, %v615_v52 }
 0x171   : > { %v537_v54 = vpop.f32.mrf.mxu0  ;;  %v946_v55 = vpop.f32.mrf.mxu3 }
 0x172   : > { %v538_v56 = vadd.f32 %v1378_v1, %v537_v54  ;;  %v947_v57 = vadd.f32 %v1478_v36, %v946_v55  ;;  %v691_v5 = vmax.f32 %v616_v61, 0.0 }
 0x174   : > { %v660_v59 = vmax.f32 %v538_v56, 0.0  ;;  %1050 = vst.msk [vmem:[%s1485_s16 + $0x130] sm:$0xff] %vm1011_vm2, %v947_v57 }
 0x175   : > { %v871_v60 = vpop.f32.mrf.mxu1 }
 0x176   : > { %v711_v62 = vpack.c.bf16 %v660_v59, %v659_v58  ;;  %v872_v63 = vadd.f32 %v1478_v36, %v871_v60 }
 0x177   : > { %v617_v0 = vpop.f32.mrf.mxu2 }
 0x178   : > { %1020 = vst.msk [vmem:[%s1485_s16 + $0x40] sm:$0xff] %vm1011_vm2, %v872_v63  ;;  %v618_v2 = vadd.f32 %v1378_v1, %v617_v0  ;;  %1205 = vmatmul.msk.bf16.gmra.mxu1 %vm742_vm1, %v711_v62 }
 0x179   : > { %v540_v3 = vpop.f32.mrf.mxu0  ;;  %v948_v4 = vpop.f32.mrf.mxu3 }
 0x17a   : > { %v692_v6 = vmax.f32 %v618_v2, 0.0  ;;  %v949_v7 = vadd.f32 %v1478_v36, %v948_v4  ;;  %v541_v12 = vadd.f32 %v1378_v1, %v540_v3 }
 0x17c   : > { %v727_v8 = vpack.c.bf16 %v692_v6, %v691_v5  ;;  %1051 = vst.msk [vmem:[%s1485_s16 + $0x138] sm:$0xff] %vm1011_vm2, %v949_v7  ;;  %v661_v17 = vmax.f32 %v541_v12, 0.0 }
 0x17d   : > { %v873_v9 = vpop.f32.mrf.mxu1 }
 0x17e   : > { %v874_v10 = vadd.f32 %v1478_v36, %v873_v9  ;;  %1221 = vmatmul.msk.bf16.gmra.mxu3 %vm742_vm1, %v727_v8 }
 0x17f   : > { %v620_v11 = vpop.f32.mrf.mxu2 }
 0x180   : > { %1021 = vst.msk [vmem:[%s1485_s16 + $0x48] sm:$0xff] %vm1011_vm2, %v874_v10  ;;  %v621_v20 = vadd.f32 %v1378_v1, %v620_v11 }
 0x181   : > { %v542_v13 = vpop.f32.mrf.mxu0  ;;  %v951_v14 = vpop.f32.mrf.mxu3 }
 0x182   : > { %v543_v15 = vadd.f32 %v1378_v1, %v542_v13  ;;  %v952_v16 = vadd.f32 %v1478_v36, %v951_v14  ;;  %v693_v28 = vmax.f32 %v621_v20, 0.0 }
 0x184   : > { %v662_v18 = vmax.f32 %v543_v15, 0.0  ;;  %1052 = vst.msk [vmem:[%s1485_s16 + $0x140] sm:$0xff] %vm1011_vm2, %v952_v16 }
 0x185   : > { %v876_v19 = vpop.f32.mrf.mxu1 }
 0x186   : > { %v712_v22 = vpack.c.bf16 %v662_v18, %v661_v17  ;;  %v877_v23 = vadd.f32 %v1478_v36, %v876_v19 }
 0x187   : > { %v622_v24 = vpop.f32.mrf.mxu2 }
 0x188   : > { %1022 = vst.msk [vmem:[%s1485_s16 + $0x50] sm:$0xff] %vm1011_vm2, %v877_v23  ;;  %v623_v25 = vadd.f32 %v1378_v1, %v622_v24  ;;  %1206 = vmatmul.msk.bf16.gmra.mxu1 %vm742_vm1, %v712_v22 }
 0x189   : > { %v545_v26 = vpop.f32.mrf.mxu0  ;;  %v953_v27 = vpop.f32.mrf.mxu3 }
 0x18a   : > { %v694_v29 = vmax.f32 %v623_v25, 0.0  ;;  %v954_v30 = vadd.f32 %v1478_v36, %v953_v27  ;;  %v546_v35 = vadd.f32 %v1378_v1, %v545_v26 }
 0x18c   : > { %v728_v31 = vpack.c.bf16 %v694_v29, %v693_v28  ;;  %1053 = vst.msk [vmem:[%s1485_s16 + $0x148] sm:$0xff] %vm1011_vm2, %v954_v30  ;;  %v663_v41 = vmax.f32 %v546_v35, 0.0 }
 0x18d   : > { %v878_v32 = vpop.f32.mrf.mxu1 }
 0x18e   : > { %v879_v33 = vadd.f32 %v1478_v36, %v878_v32  ;;  %1222 = vmatmul.msk.bf16.gmra.mxu3 %vm742_vm1, %v728_v31 }
 0x18f   : > { %v625_v34 = vpop.f32.mrf.mxu2 }
 0x190   : > { %1023 = vst.msk [vmem:[%s1485_s16 + $0x58] sm:$0xff] %vm1011_vm2, %v879_v33  ;;  %v626_v44 = vadd.f32 %v1378_v1, %v625_v34 }
 0x191   : > { %v547_v37 = vpop.f32.mrf.mxu0  ;;  %v956_v38 = vpop.f32.mrf.mxu3 }
 0x192   : > { %v548_v39 = vadd.f32 %v1378_v1, %v547_v37  ;;  %v957_v40 = vadd.f32 %v1478_v36, %v956_v38  ;;  %v695_v51 = vmax.f32 %v626_v44, 0.0 }
 0x194   : > { %v664_v42 = vmax.f32 %v548_v39, 0.0  ;;  %1054 = vst.msk [vmem:[%s1485_s16 + $0x150] sm:$0xff] %vm1011_vm2, %v957_v40 }
 0x195   : > { %v881_v43 = vpop.f32.mrf.mxu1 }
 0x196   : > { %v713_v45 = vpack.c.bf16 %v664_v42, %v663_v41  ;;  %v882_v46 = vadd.f32 %v1478_v36, %v881_v43 }
 0x197   : > { %v627_v47 = vpop.f32.mrf.mxu2 }
 0x198   : > { %1024 = vst.msk [vmem:[%s1485_s16 + $0x60] sm:$0xff] %vm1011_vm2, %v882_v46  ;;  %v628_v48 = vadd.f32 %v1378_v1, %v627_v47  ;;  %1207 = vmatmul.msk.bf16.gmra.mxu1 %vm742_vm1, %v713_v45 }
 0x199   : > { %v550_v49 = vpop.f32.mrf.mxu0  ;;  %v958_v50 = vpop.f32.mrf.mxu3 }
 0x19a   : > { %v696_v52 = vmax.f32 %v628_v48, 0.0  ;;  %v959_v53 = vadd.f32 %v1478_v36, %v958_v50  ;;  %v551_v58 = vadd.f32 %v1378_v1, %v550_v49 }
 0x19c   : > { %v729_v54 = vpack.c.bf16 %v696_v52, %v695_v51  ;;  %1055 = vst.msk [vmem:[%s1485_s16 + $0x158] sm:$0xff] %vm1011_vm2, %v959_v53  ;;  %v665_v63 = vmax.f32 %v551_v58, 0.0 }
 0x19d   : > { %v883_v55 = vpop.f32.mrf.mxu1 }
 0x19e   : > { %v884_v56 = vadd.f32 %v1478_v36, %v883_v55  ;;  %1223 = vmatmul.msk.bf16.gmra.mxu3 %vm742_vm1, %v729_v54 }
 0x19f   : > { %v630_v57 = vpop.f32.mrf.mxu2 }
 0x1a0   : > { %1025 = vst.msk [vmem:[%s1485_s16 + $0x68] sm:$0xff] %vm1011_vm2, %v884_v56  ;;  %v631_v3 = vadd.f32 %v1378_v1, %v630_v57 }
 0x1a1   : > { %v552_v59 = vpop.f32.mrf.mxu0  ;;  %v961_v60 = vpop.f32.mrf.mxu3 }
 0x1a2   : > { %v553_v61 = vadd.f32 %v1378_v1, %v552_v59  ;;  %v962_v62 = vadd.f32 %v1478_v36, %v961_v60  ;;  %v697_v9 = vmax.f32 %v631_v3, 0.0 }
 0x1a4   : > { %v666_v0 = vmax.f32 %v553_v61, 0.0  ;;  %1056 = vst.msk [vmem:[%s1485_s16 + $0x160] sm:$0xff] %vm1011_vm2, %v962_v62 }
 0x1a5   : > { %v886_v2 = vpop.f32.mrf.mxu1 }
 0x1a6   : > { %v714_v4 = vpack.c.bf16 %v666_v0, %v665_v63  ;;  %v887_v5 = vadd.f32 %v1478_v36, %v886_v2 }
 0x1a7   : > { %v632_v6 = vpop.f32.mrf.mxu2 }
 0x1a8   : > { %1026 = vst.msk [vmem:[%s1485_s16 + $0x70] sm:$0xff] %vm1011_vm2, %v887_v5  ;;  %v633_v7 = vadd.f32 %v1378_v1, %v632_v6  ;;  %1208 = vmatmul.msk.bf16.gmra.mxu1 %vm742_vm1, %v714_v4 }
 0x1a9   : > { %v963_v8 = vpop.f32.mrf.mxu3 }
 0x1aa   : > { %v698_v10 = vmax.f32 %v633_v7, 0.0  ;;  %v964_v11 = vadd.f32 %v1478_v36, %v963_v8 }
 0x1ac   : > { %v730_v12 = vpack.c.bf16 %v698_v10, %v697_v9  ;;  %1057 = vst.msk [vmem:[%s1485_s16 + $0x168] sm:$0xff] %vm1011_vm2, %v964_v11 }
 0x1ad   : > { %v888_v13 = vpop.f32.mrf.mxu1 }
 0x1ae   : > { %v889_v14 = vadd.f32 %v1478_v36, %v888_v13  ;;  %1224 = vmatmul.msk.bf16.gmra.mxu3 %vm742_vm1, %v730_v12 }
 0x1b0   : > { %1027 = vst.msk [vmem:[%s1485_s16 + $0x78] sm:$0xff] %vm1011_vm2, %v889_v14 }
 0x1b1   : > { %v966_v1 = vpop.f32.mrf.mxu3 }
 0x1b2   : > { %v967_v15 = vadd.f32 %v1478_v36, %v966_v1 }
 0x1b4   : > { %1058 = vst.msk [vmem:[%s1485_s16 + $0x170] sm:$0xff] %vm1011_vm2, %v967_v15 }
 0x1b5   : > { %v891_v16 = vpop.f32.mrf.mxu1 }
 0x1b6   : > { %v892_v17 = vadd.f32 %v1478_v36, %v891_v16 }
 0x1b8   : > { %1028 = vst.msk [vmem:[%s1485_s16 + $0x80] sm:$0xff] %vm1011_vm2, %v892_v17  ;;  %1209 = vmatmul.msk.bf16.gmra.mxu1 %vm742_vm1, %v1391_v21 }
 0x1b9   : > { %v968_v18 = vpop.f32.mrf.mxu3 }
 0x1ba   : > { %v969_v19 = vadd.f32 %v1478_v36, %v968_v18 }
 0x1bc   : > { %1059 = vst.msk [vmem:[%s1485_s16 + $0x178] sm:$0xff] %vm1011_vm2, %v969_v19 }
 0x1bd   : > { %v893_v20 = vpop.f32.mrf.mxu1 }
 0x1be   : > { %v894_v22 = vadd.f32 %v1478_v36, %v893_v20 }
 0x1c0   : > { %1029 = vst.msk [vmem:[%s1485_s16 + $0x88] sm:$0xff] %vm1011_vm2, %v894_v22 }
 0x1c1   : > { %v971_v23 = vpop.f32.mrf.mxu3 }
 0x1c2   : > { %v972_v24 = vadd.f32 %v1478_v36, %v971_v23 }
 0x1c4   : > { %1060 = vst.msk [vmem:[%s1485_s16 + $0x180] sm:$0xff] %vm1011_vm2, %v972_v24 }
 0x1c5   : > { %v896_v25 = vpop.f32.mrf.mxu1 }
 0x1c6   : > { %v897_v21 = vadd.f32 %v1478_v36, %v896_v25 }
 0x1c8   : > { %1030 = vst.msk [vmem:[%s1485_s16 + $0x90] sm:$0xff] %vm1011_vm2, %v897_v21 }
 0x1c9   : > { %v973_v26 = vpop.f32.mrf.mxu3 }
 0x1ca   : > { %v974_v27 = vadd.f32 %v1478_v36, %v973_v26 }
 0x1cc   : > { %1061 = vst.msk [vmem:[%s1485_s16 + $0x188] sm:$0xff] %vm1011_vm2, %v974_v27 }
 0x1cd   : > { %v898_v28 = vpop.f32.mrf.mxu1 }
 0x1ce   : > { %v899_v29 = vadd.f32 %v1478_v36, %v898_v28 }
 0x1d0   : > { %1031 = vst.msk [vmem:[%s1485_s16 + $0x98] sm:$0xff] %vm1011_vm2, %v899_v29 }
 0x1d1   : > { %v976_v30 = vpop.f32.mrf.mxu3 }
 0x1d2   : > { %v977_v31 = vadd.f32 %v1478_v36, %v976_v30 }
 0x1d4   : > { %1062 = vst.msk [vmem:[%s1485_s16 + $0x190] sm:$0xff] %vm1011_vm2, %v977_v31 }
 0x1d5   : > { %v901_v32 = vpop.f32.mrf.mxu1 }
 0x1d6   : > { %v902_v33 = vadd.f32 %v1478_v36, %v901_v32 }
 0x1d8   : > { %1032 = vst.msk [vmem:[%s1485_s16 + $0xa0] sm:$0xff] %vm1011_vm2, %v902_v33 }
 0x1d9   : > { %v978_v34 = vpop.f32.mrf.mxu3 }
 0x1da   : > { %v979_v35 = vadd.f32 %v1478_v36, %v978_v34 }
 0x1dc   : > { %1063 = vst.msk [vmem:[%s1485_s16 + $0x198] sm:$0xff] %vm1011_vm2, %v979_v35 }
 0x1dd   : > { %v903_v37 = vpop.f32.mrf.mxu1 }
 0x1de   : > { %v904_v38 = vadd.f32 %v1478_v36, %v903_v37 }
 0x1e0   : > { %1033 = vst.msk [vmem:[%s1485_s16 + $0xa8] sm:$0xff] %vm1011_vm2, %v904_v38 }
 0x1e1   : > { %v981_v39 = vpop.f32.mrf.mxu3 }
 0x1e2   : > { %v982_v40 = vadd.f32 %v1478_v36, %v981_v39 }
 0x1e4   : > { %1064 = vst.msk [vmem:[%s1485_s16 + $0x1a0] sm:$0xff] %vm1011_vm2, %v982_v40 }
 0x1e5   : > { %v906_v41 = vpop.f32.mrf.mxu1 }
 0x1e6   : > { %v907_v42 = vadd.f32 %v1478_v36, %v906_v41 }
 0x1e8   : > { %1034 = vst.msk [vmem:[%s1485_s16 + $0xb0] sm:$0xff] %vm1011_vm2, %v907_v42 }
 0x1e9   : > { %v983_v43 = vpop.f32.mrf.mxu3 }
 0x1ea   : > { %v984_v44 = vadd.f32 %v1478_v36, %v983_v43 }
 0x1ec   : > { %1065 = vst.msk [vmem:[%s1485_s16 + $0x1a8] sm:$0xff] %vm1011_vm2, %v984_v44 }
 0x1ed   : > { %v908_v45 = vpop.f32.mrf.mxu1 }
 0x1ee   : > { %v909_v46 = vadd.f32 %v1478_v36, %v908_v45 }
 0x1f0   : > { %1035 = vst.msk [vmem:[%s1485_s16 + $0xb8] sm:$0xff] %vm1011_vm2, %v909_v46 }
 0x1f1   : > { %v986_v47 = vpop.f32.mrf.mxu3 }
 0x1f2   : > { %v987_v48 = vadd.f32 %v1478_v36, %v986_v47 }
 0x1f4   : > { %1066 = vst.msk [vmem:[%s1485_s16 + $0x1b0] sm:$0xff] %vm1011_vm2, %v987_v48 }
 0x1f5   : > { %v911_v49 = vpop.f32.mrf.mxu1 }
 0x1f6   : > { %v912_v50 = vadd.f32 %v1478_v36, %v911_v49 }
 0x1f8   : > { %1036 = vst.msk [vmem:[%s1485_s16 + $0xc0] sm:$0xff] %vm1011_vm2, %v912_v50 }
 0x1f9   : > { %v988_v51 = vpop.f32.mrf.mxu3 }
 0x1fa   : > { %v989_v52 = vadd.f32 %v1478_v36, %v988_v51 }
 0x1fc   : > { %1067 = vst.msk [vmem:[%s1485_s16 + $0x1b8] sm:$0xff] %vm1011_vm2, %v989_v52 }
 0x1fd   : > { %v913_v53 = vpop.f32.mrf.mxu1 }
 0x1fe   : > { %v914_v54 = vadd.f32 %v1478_v36, %v913_v53 }
 0x200   : > { %1037 = vst.msk [vmem:[%s1485_s16 + $0xc8] sm:$0xff] %vm1011_vm2, %v914_v54 }
 0x201   : > { %v991_v55 = vpop.f32.mrf.mxu3 }
 0x202   : > { %v992_v56 = vadd.f32 %v1478_v36, %v991_v55 }
 0x204   : > { %1068 = vst.msk [vmem:[%s1485_s16 + $0x1c0] sm:$0xff] %vm1011_vm2, %v992_v56 }
 0x205   : > { %v916_v57 = vpop.f32.mrf.mxu1 }
 0x206   : > { %v917_v58 = vadd.f32 %v1478_v36, %v916_v57 }
 0x208   : > { %1038 = vst.msk [vmem:[%s1485_s16 + $0xd0] sm:$0xff] %vm1011_vm2, %v917_v58 }
 0x209   : > { %v993_v59 = vpop.f32.mrf.mxu3 }
 0x20a   : > { %v994_v60 = vadd.f32 %v1478_v36, %v993_v59 }
 0x20c   : > { %1069 = vst.msk [vmem:[%s1485_s16 + $0x1c8] sm:$0xff] %vm1011_vm2, %v994_v60 }
 0x20d   : > { %v918_v61 = vpop.f32.mrf.mxu1 }
 0x20e   : > { %v919_v62 = vadd.f32 %v1478_v36, %v918_v61 }
 0x210   : > { %1039 = vst.msk [vmem:[%s1485_s16 + $0xd8] sm:$0xff] %vm1011_vm2, %v919_v62 }
 0x211   : > { %v996_v63 = vpop.f32.mrf.mxu3 }
 0x212   : > { %v997_v0 = vadd.f32 %v1478_v36, %v996_v63 }
 0x214   : > { %1070 = vst.msk [vmem:[%s1485_s16 + $0x1d0] sm:$0xff] %vm1011_vm2, %v997_v0 }
 0x215   : > { %v921_v2 = vpop.f32.mrf.mxu1 }
 0x216   : > { %v922_v3 = vadd.f32 %v1478_v36, %v921_v2 }
 0x218   : > { %1040 = vst.msk [vmem:[%s1485_s16 + $0xe0] sm:$0xff] %vm1011_vm2, %v922_v3 }
 0x219   : > { %v998_v4 = vpop.f32.mrf.mxu3 }
 0x21a   : > { %v999_v5 = vadd.f32 %v1478_v36, %v998_v4 }
 0x21c   : > { %1071 = vst.msk [vmem:[%s1485_s16 + $0x1d8] sm:$0xff] %vm1011_vm2, %v999_v5 }
 0x21d   : > { %v923_v6 = vpop.f32.mrf.mxu1 }
 0x21e   : > { %v924_v7 = vadd.f32 %v1478_v36, %v923_v6 }
 0x220   : > { %1041 = vst.msk [vmem:[%s1485_s16 + $0xe8] sm:$0xff] %vm1011_vm2, %v924_v7 }
 0x221   : > { %v1001_v8 = vpop.f32.mrf.mxu3 }
 0x222   : > { %v1002_v9 = vadd.f32 %v1478_v36, %v1001_v8 }
 0x224   : > { %1072 = vst.msk [vmem:[%s1485_s16 + $0x1e0] sm:$0xff] %vm1011_vm2, %v1002_v9 }
 0x225   : > { %v926_v10 = vpop.f32.mrf.mxu1 }
 0x226   : > { %v927_v11 = vadd.f32 %v1478_v36, %v926_v10 }
 0x228   : > { %1042 = vst.msk [vmem:[%s1485_s16 + $0xf0] sm:$0xff] %vm1011_vm2, %v927_v11 }
 0x229   : > { %v1003_v12 = vpop.f32.mrf.mxu3 }
 0x22a   : > { %v1004_v13 = vadd.f32 %v1478_v36, %v1003_v12 }
 0x22c   : > { %1073 = vst.msk [vmem:[%s1485_s16 + $0x1e8] sm:$0xff] %vm1011_vm2, %v1004_v13 }
 0x22d   : > { %v928_v14 = vpop.f32.mrf.mxu1 }
 0x22e   : > { %v929_v1 = vadd.f32 %v1478_v36, %v928_v14 }
 0x230   : > { %1043 = vst.msk [vmem:[%s1485_s16 + $0xf8] sm:$0xff] %vm1011_vm2, %v929_v1 }
 0x231   : > { %v1006_v15 = vpop.f32.mrf.mxu3 }
 0x232   : > { %v1007_v16 = vadd.f32 %v1478_v36, %v1006_v15 }
 0x234   : > { %1074 = vst.msk [vmem:[%s1485_s16 + $0x1f0] sm:$0xff] %vm1011_vm2, %v1007_v16 }
 0x235   : > { %v931_v17 = vpop.f32.mrf.mxu1 }
 0x236   : > { %v932_v18 = vadd.f32 %v1478_v36, %v931_v17 }
 0x238   : > { %1044 = vst.msk [vmem:[%s1485_s16 + $0x100] sm:$0xff] %vm1011_vm2, %v932_v18 }
 0x239   : > { %v1008_v19 = vpop.f32.mrf.mxu3 }
 0x23a   : > { %v1009_v20 = vadd.f32 %v1478_v36, %v1008_v19 }
 0x23c   : > { %1075 = vst.msk [vmem:[%s1485_s16 + $0x1f8] sm:$0xff] %vm1011_vm2, %v1009_v20 }
 0x23d   : > { %v933_v22 = vpop.f32.mrf.mxu1 }
 0x23e   : > { %v934_v23 = vadd.f32 %v1478_v36, %v933_v22 }
 0x240   : > { %1045 = vst.msk [vmem:[%s1485_s16 + $0x108] sm:$0xff] %vm1011_vm2, %v934_v23 }
 0x241 PF: > { %s15_s18 = sadd.s32 1, %s1253_s18  }
 0x242   : > { %p12_p4 = scmp.ge.s32.totalorder %s15_s18, 4  }
 0x244   :  { %14 = sbr.rel (!%p12_p4) target bundleno = 1 (0x1), region = 70 }

</bundles_post_ra>
